<compile_context>
chip_gen: v7x
topology: tpu7x:2x2x1
jax: 0.10.0
libtpu: 0.0.40
codegen_flags: <defaults>
</compile_context>

<pallas_src>
import jax
import jax.numpy as jnp
from jax.experimental import pallas as pl
from jax.experimental.pallas import tpu as pltpu


def se_block_kernel(x_ref, w1_ref, b1_ref, w2_ref, b2_ref, o_ref):
    # Squeeze: sum-pool over the lane (H*W) axis with an f32 accumulator.
    # (The 1/(H*W) mean factor is pre-folded into w1 by the wrapper; padded
    #  lanes are zero, so they do not perturb the sum.)
    pooled = jnp.sum(x_ref[...], axis=-1, dtype=jnp.float32)          # (bB, C)

    # Excite: FC1 -> Swish -> FC2 -> Sigmoid (tiny matmuls, f32).
    h = jnp.dot(pooled, w1_ref[...], preferred_element_type=jnp.float32) + b1_ref[...]
    h = h * jax.nn.sigmoid(h)                                         # Swish
    y = jnp.dot(h, w2_ref[...], preferred_element_type=jnp.float32) + b2_ref[...]
    y = jax.nn.sigmoid(y)                                             # (bB, C) gates

    # Scale: re-read x in its native dtype (input buffer is VMEM-resident, so
    # the second read is free vs. the HBM roofline) and broadcast the
    # per-(batch, channel) gate across lanes.
    gate = y.astype(o_ref.dtype)
    o_ref[...] = x_ref[...] * gate[:, :, None]


def _tpu_vmem_capacity_bytes():
    try:
        return int(pltpu.get_tpu_info().vmem_capacity_bytes)
    except Exception:
        return 64 * 1024 * 1024  # conservative: v7x per-TC VMEM


def _default_target_block_bytes():
    try:
        kind = jax.devices()[0].device_kind.lower()
    except Exception:
        kind = ""
    # v5e (~820 GB/s HBM): 1-4 MiB blocks already amortize per-step overhead.
    if "v5 lite" in kind or "v5lite" in kind or "v5e" in kind:
        return 4 * 1024 * 1024
    # v6e / v7x: faster HBM -> larger blocks to keep the ~0.35us/step overhead <5%.
    return 8 * 1024 * 1024


def _pick_batch_block(batch, bytes_per_batch, target_bytes):
    """Largest divisor of `batch` whose x-block fits `target_bytes`, while
    keeping >= 2 grid steps whenever batch >= 2 (so both v7x TCs get work)."""
    best = 1
    for bb in range(1, batch + 1):
        if batch % bb:
            continue
        if bb * bytes_per_batch > target_bytes:
            continue
        if batch >= 2 and batch // bb < 2:
            continue
        best = bb
    return best


def se_block(x, w1, b1, w2, b2, *, target_block_bytes=None, donate_x=False):
    """x: (B, C, H, W); w1: (C, Ch); b1: (1, Ch); w2: (Ch, C); b2: (1, C)."""
    B, C, H, W = x.shape
    HW = H * W
    if target_block_bytes is None:
        target_block_bytes = _default_target_block_bytes()

    # Lane-dense layout: H*W on the last (128-lane) axis, padded to a lane
    # multiple so DMAs and stores are unmasked / dense.
    LANE = 128
    HW_pad = ((HW + LANE - 1) // LANE) * LANE
    x2 = x.reshape(B, C, HW)
    if HW_pad != HW:
        x2 = jnp.pad(x2, ((0, 0), (0, 0), (0, HW_pad - HW)))

    # Fold the 1/(H*W) mean scale into w1 so the kernel pools with a plain sum.
    w1_scaled = (w1 * (1.0 / float(HW))).astype(w1.dtype)

    bytes_per_batch = C * HW_pad * x.dtype.itemsize
    bB = _pick_batch_block(B, bytes_per_batch, target_block_bytes)
    grid = (B // bB,)

    block_bytes = bB * bytes_per_batch
    weight_bytes = sum(int(a.size) * a.dtype.itemsize for a in (w1, b1, w2, b2))
    # 2x double-buffered input block + 2x output block + 2x weights + headroom.
    budget = 4 * block_bytes + 2 * weight_bytes + 2 * 1024 * 1024

    vmem_ceiling = max(32 * 1024 * 1024, int(0.75 * _tpu_vmem_capacity_bytes()))
    if budget > vmem_ceiling:
        # TODO(synk): two-pass pool+rescale for rows too large for one VMEM block.
        raise ValueError(
            f"SEBlock row of {bytes_per_batch} bytes needs ~{budget} bytes of VMEM "
            f"(> {vmem_ceiling} available); a two-pass pool+rescale kernel is required."
        )
    vmem_limit = int(min(vmem_ceiling, max(16 * 1024 * 1024, budget)))

    x_spec = pl.BlockSpec((bB, C, HW_pad), lambda b: (b, 0, 0))
    w1_spec = pl.BlockSpec(w1.shape, lambda b: (0, 0))
    b1_spec = pl.BlockSpec(b1.shape, lambda b: (0, 0))
    w2_spec = pl.BlockSpec(w2.shape, lambda b: (0, 0))
    b2_spec = pl.BlockSpec(b2.shape, lambda b: (0, 0))

    out2 = pl.pallas_call(
        se_block_kernel,
        out_shape=jax.ShapeDtypeStruct((B, C, HW_pad), x.dtype),
        grid=grid,
        in_specs=[x_spec, w1_spec, b1_spec, w2_spec, b2_spec],
        out_specs=x_spec,
        input_output_aliases=({0: 0} if donate_x else {}),
        compiler_params=pltpu.CompilerParams(
            dimension_semantics=("parallel",),
            vmem_limit_bytes=vmem_limit,
        ),
    )(x2, w1_scaled, b1, w2, b2)

    if HW_pad != HW:
        out2 = out2[:, :, :HW]
    return out2.reshape(B, C, H, W)


def se_block_ref(x, w1, b1, w2, b2):
    """Pure-JAX reference for correctness checking."""
    pooled = jnp.mean(x.astype(jnp.float32), axis=(2, 3))
    h = pooled @ w1 + b1
    h = h * jax.nn.sigmoid(h)
    y = jax.nn.sigmoid(h @ w2 + b2)
    return (x * y[:, :, None, None]).astype(x.dtype)


def init_params(key, in_channels, reduction=8):
    """Deterministic synthetic init (PyTorch Linear-style uniform bounds)."""
    hidden = in_channels // reduction
    k1, k2, k3, k4 = jax.random.split(key, 4)
    bound1 = 1.0 / jnp.sqrt(in_channels)
    bound2 = 1.0 / jnp.sqrt(hidden)
    # Stored as (in, out), i.e. already transposed relative to PyTorch's (out, in).
    w1 = jax.random.uniform(k1, (in_channels, hidden), jnp.float32, -bound1, bound1)
    b1 = jax.random.uniform(k2, (1, hidden), jnp.float32, -bound1, bound1)
    w2 = jax.random.uniform(k3, (hidden, in_channels), jnp.float32, -bound2, bound2)
    b2 = jax.random.uniform(k4, (1, in_channels), jnp.float32, -bound2, bound2)
    return w1, b1, w2, b2


if __name__ == "__main__":
    key = jax.random.PRNGKey(0)

    # --- Test 1: small shape consistent with the module (reduction=8 -> hidden=2).
    kx, kp = jax.random.split(key)
    B, C, H, W = 2, 16, 16, 16
    x = jax.random.normal(kx, (B, C, H, W), jnp.float32)
    w1, b1, w2, b2 = init_params(kp, C, reduction=8)

    out = jax.block_until_ready(se_block(x, w1, b1, w2, b2))
    ref = se_block_ref(x, w1, b1, w2, b2)
    assert out.shape == x.shape and out.dtype == x.dtype
    assert jnp.allclose(out, ref, atol=1e-5, rtol=1e-5)

    # --- Test 2: larger batch with a small block budget to exercise a multi-step
    # batch grid (double-buffered pipeline) plus input/output aliasing.
    kx2, kp2 = jax.random.split(jax.random.PRNGKey(1))
    B2, C2, H2, W2 = 16, 64, 32, 32
    x2 = jax.random.normal(kx2, (B2, C2, H2, W2), jnp.float32)
    p2 = init_params(kp2, C2, reduction=8)

    out2 = jax.block_until_ready(
        se_block(x2, *p2, target_block_bytes=1 * 1024 * 1024, donate_x=True))
    ref2 = se_block_ref(x2, *p2)
    assert out2.shape == x2.shape and out2.dtype == x2.dtype
    assert jnp.allclose(out2, ref2, atol=1e-5, rtol=1e-5)

    # --- Test 3: SE-typical non-128-multiple spatial size (7x7) exercises the
    # lane-padding path.
    kx3, kp3 = jax.random.split(jax.random.PRNGKey(2))
    B3, C3, H3, W3 = 4, 32, 7, 7
    x3 = jax.random.normal(kx3, (B3, C3, H3, W3), jnp.float32)
    p3 = init_params(kp3, C3, reduction=8)

    out3 = jax.block_until_ready(se_block(x3, *p3))
    ref3 = se_block_ref(x3, *p3)
    assert out3.shape == x3.shape and out3.dtype == x3.dtype
    assert jnp.allclose(out3, ref3, atol=1e-5, rtol=1e-5)

    print("KERNEL_OK")
</pallas_src>

<mosaic_0001>
module attributes {stable_mosaic.version = 11 : i64} {
  func.func @se_block_kernel(%arg0: i32, %arg1: memref<1x16x256xf32, #tpu.memory_space<vmem>>, %arg2: memref<16x2xf32, #tpu.memory_space<vmem>>, %arg3: memref<1x2xf32, #tpu.memory_space<vmem>>, %arg4: memref<2x16xf32, #tpu.memory_space<vmem>>, %arg5: memref<1x16xf32, #tpu.memory_space<vmem>>, %arg6: memref<1x16x256xf32, #tpu.memory_space<vmem>>) attributes {dimension_semantics = [#tpu.dimension_semantics<parallel>], iteration_bounds = array<i64: 2>, scalar_prefetch = 0 : i64, scratch_operands = 0 : i64, tpu.core_type = #tpu.core_type<tc>, window_params = [{transform_indices = @transform_0, window_bounds = array<i64: 1, 16, 256>}, {pipeline_mode = #tpu.pipeline_mode<synchronous>, transform_indices = @transform_1, window_bounds = array<i64: 16, 2>}, {pipeline_mode = #tpu.pipeline_mode<synchronous>, transform_indices = @transform_2, window_bounds = array<i64: 1, 2>}, {pipeline_mode = #tpu.pipeline_mode<synchronous>, transform_indices = @transform_3, window_bounds = array<i64: 2, 16>}, {pipeline_mode = #tpu.pipeline_mode<synchronous>, transform_indices = @transform_4, window_bounds = array<i64: 1, 16>}, {transform_indices = @transform_5, window_bounds = array<i64: 1, 16, 256>}]} {
    %c0 = arith.constant 0 : index
    %c0_0 = arith.constant 0 : index
    %c0_1 = arith.constant 0 : index
    %0 = vector.load %arg1[%c0, %c0_0, %c0_1] : memref<1x16x256xf32, #tpu.memory_space<vmem>>, vector<1x16x256xf32>
    %cst = arith.constant dense<0.000000e+00> : vector<1x16xf32>
    %1 = vector.multi_reduction <add>, %0, %cst [2] : vector<1x16x256xf32> to vector<1x16xf32>
    %c0_2 = arith.constant 0 : index
    %c0_3 = arith.constant 0 : index
    %2 = vector.load %arg2[%c0_2, %c0_3] : memref<16x2xf32, #tpu.memory_space<vmem>>, vector<16x2xf32>
    %cst_4 = arith.constant dense<0.000000e+00> : vector<1x2xf32>
    %3 = tpu.matmul %1, %2, %cst_4 {dimension_numbers = #tpu.dot_dimension_numbers<[1], [0], [0], [1], [0, 0, 1, 1], [], []>} : vector<1x16xf32>, vector<16x2xf32>, vector<1x2xf32> -> vector<1x2xf32>
    %c0_5 = arith.constant 0 : index
    %c0_6 = arith.constant 0 : index
    %4 = vector.load %arg3[%c0_5, %c0_6] : memref<1x2xf32, #tpu.memory_space<vmem>>, vector<1x2xf32>
    %5 = arith.addf %3, %4 : vector<1x2xf32>
    %6 = arith.negf %5 : vector<1x2xf32>
    %7 = math.exp %6 : vector<1x2xf32>
    %cst_7 = arith.constant 1.000000e+00 : f32
    %8 = vector.broadcast %cst_7 : f32 to vector<1x2xf32>
    %9 = arith.addf %8, %7 : vector<1x2xf32>
    %10 = arith.divf %8, %9 : vector<1x2xf32>
    %11 = arith.mulf %5, %10 : vector<1x2xf32>
    %c0_8 = arith.constant 0 : index
    %c0_9 = arith.constant 0 : index
    %12 = vector.load %arg4[%c0_8, %c0_9] : memref<2x16xf32, #tpu.memory_space<vmem>>, vector<2x16xf32>
    %cst_10 = arith.constant dense<0.000000e+00> : vector<1x16xf32>
    %13 = tpu.matmul %11, %12, %cst_10 {dimension_numbers = #tpu.dot_dimension_numbers<[1], [0], [0], [1], [0, 0, 1, 1], [], []>} : vector<1x2xf32>, vector<2x16xf32>, vector<1x16xf32> -> vector<1x16xf32>
    %c0_11 = arith.constant 0 : index
    %c0_12 = arith.constant 0 : index
    %14 = vector.load %arg5[%c0_11, %c0_12] : memref<1x16xf32, #tpu.memory_space<vmem>>, vector<1x16xf32>
    %15 = arith.addf %13, %14 : vector<1x16xf32>
    %16 = arith.negf %15 : vector<1x16xf32>
    %17 = math.exp %16 : vector<1x16xf32>
    %cst_13 = arith.constant 1.000000e+00 : f32
    %18 = vector.broadcast %cst_13 : f32 to vector<1x16xf32>
    %19 = arith.addf %18, %17 : vector<1x16xf32>
    %20 = arith.divf %18, %19 : vector<1x16xf32>
    %c0_14 = arith.constant 0 : index
    %c0_15 = arith.constant 0 : index
    %c0_16 = arith.constant 0 : index
    %21 = vector.load %arg1[%c0_14, %c0_15, %c0_16] : memref<1x16x256xf32, #tpu.memory_space<vmem>>, vector<1x16x256xf32>
    %22 = vector.shape_cast %20 : vector<1x16xf32> to vector<1x16x1xf32>
    %23 = vector.broadcast %22 : vector<1x16x1xf32> to vector<1x16x256xf32>
    %24 = arith.mulf %21, %23 : vector<1x16x256xf32>
    %c0_17 = arith.constant 0 : index
    %c0_18 = arith.constant 0 : index
    %c0_19 = arith.constant 0 : index
    %25 = vector.load %arg6[%c0_17, %c0_18, %c0_19] : memref<1x16x256xf32, #tpu.memory_space<vmem>>, vector<1x16x256xf32>
    tpu.vector_store %arg6[%c0_17, %c0_18, %c0_19], %24 {strides = array<i32>} : memref<1x16x256xf32, #tpu.memory_space<vmem>>, vector<1x16x256xf32>,
    return
  }
  func.func @transform_0(%arg0: i32) -> (i32, i32, i32) {
    %c0_i32 = arith.constant 0 : i32
    %c0_i32_0 = arith.constant 0 : i32
    %c0_i32_1 = arith.constant 0 : i32
    return %arg0, %c0_i32, %c0_i32_0 : i32, i32, i32
  }
  func.func @transform_1(%arg0: i32) -> (i32, i32) {
    %c0_i32 = arith.constant 0 : i32
    %c0_i32_0 = arith.constant 0 : i32
    %c0_i32_1 = arith.constant 0 : i32
    return %c0_i32, %c0_i32_0 : i32, i32
  }
  func.func @transform_2(%arg0: i32) -> (i32, i32) {
    %c0_i32 = arith.constant 0 : i32
    %c0_i32_0 = arith.constant 0 : i32
    %c0_i32_1 = arith.constant 0 : i32
    return %c0_i32, %c0_i32_0 : i32, i32
  }
  func.func @transform_3(%arg0: i32) -> (i32, i32) {
    %c0_i32 = arith.constant 0 : i32
    %c0_i32_0 = arith.constant 0 : i32
    %c0_i32_1 = arith.constant 0 : i32
    return %c0_i32, %c0_i32_0 : i32, i32
  }
  func.func @transform_4(%arg0: i32) -> (i32, i32) {
    %c0_i32 = arith.constant 0 : i32
    %c0_i32_0 = arith.constant 0 : i32
    %c0_i32_1 = arith.constant 0 : i32
    return %c0_i32, %c0_i32_0 : i32, i32
  }
  func.func @transform_5(%arg0: i32) -> (i32, i32, i32) {
    %c0_i32 = arith.constant 0 : i32
    %c0_i32_0 = arith.constant 0 : i32
    %c0_i32_1 = arith.constant 0 : i32
    return %arg0, %c0_i32, %c0_i32_0 : i32, i32, i32
  }
}

</mosaic_0001>

<bundles_post_ra>
// kernel: tpu_custom_call.1
= control target key start
LH: loop header
LB: loop body
LE: loop exit
PB: predicated region body
PF: predicated region fallthrough
CT: control target
= control target key end

     0   :  { %10 = vsyncpa [#allocation3], 0  ;;  %s979_s0 = inlined_call_operand.hbm [shape: f32[2,16,256], index: 0, kind: input, shape index: {}]   ;;  %s980_s1 = inlined_call_operand.vmem [shape: f32[16,2], index: 1, kind: input, shape index: {}]   ;;  %s981_s2 = inlined_call_operand.vmem [shape: f32[1,2], index: 2, kind: input, shape index: {}]   ;;  %s982_s3 = inlined_call_operand.vmem [shape: f32[2,16], index: 3, kind: input, shape index: {}]   ;;  %s983_s4 = inlined_call_operand.vmem [shape: f32[1,16], index: 4, kind: input, shape index: {}]   ;;  %s984_s5 = inlined_call_operand.hbm [shape: f32[2,16,256], index: 5, kind: output, shape index: {}]  }
   0x1   :  { %12 = vsyncpa [#allocation3 + $0x1], 0 }
   0x2   :  { %13 = vsyncpa [#allocation4], 0 }
   0x3   :  { %15 = vsyncpa [#allocation4 + $0x1], 0  ;;  %s782_s18 = smov 0   ;;  %s784_s19 = smov 0  }
   0x4   :  { %s786_s20 = smov 0   ;;  %s788_s21 = smov 0  }
   0x5 LB: > { %s803_s22 = sadd.s32 4294967295, %s741_s21   ;;  %s543_s23 = sadd.s32 4294967294, %s741_s21   ;;  %s741_s21 = sphi %s788_s21, %s997_s21   ;;  %s737_s20 = sphi %s786_s20, %s996_s20   ;;  %s733_s19 = sphi %s784_s19, %s995_s19   ;;  %s729_s18 = sphi %s782_s18, %s994_s18  }
   0x6   : > { %s807_s24 = sadd.s32 1, %s741_s21   ;;  %s28_s25 = sadd.s32 1, %s737_s20 }
   0x7   : > { %s25_s26 = ssub.s32 %s741_s21, %s807_s24  ;;  %p35_p0 = scmp.ne.s32.totalorder %s737_s20, %s733_s19 }
   0x8   : > { %p26_p1 = scmp.eq.s32.totalorder %s25_s26, 0  ;;  %p36_p2 = scmp.eq.s32.totalorder %s741_s21, 0 }
   0x9   : > { %p41_p3 = scmp.ne.s32.totalorder %s733_s19, %s729_s18  ;;  %p42_p4 = scmp.eq.s32.totalorder %s803_s22, 0 }
   0xa   : > { %s819_s27 = scalar_select %p26_p1, %s737_s20, %s28_s25  }
   0xb   : > { %p821_p5 = por %p36_p2, %p35_p0  ;;  %p825_p6 = por %p42_p4, %p41_p3 }
   0xc   : > { %p149_p7 = scmp.eq.s32.totalorder %s803_s22, 1  ;;  %p155_p8 = scmp.eq.s32.totalorder %s543_s23, 1 }
   0xd   : > { %p596_p10 = scmp.lt.s32.totalorder %s741_s21, 2  ;;  %s187_s7 = sand.u32 1, %s737_s20  }
   0xe   : > { %p832_p11 = por %p149_p7, %p35_p0  ;;  %p836_p12 = por %p155_p8, %p41_p3 }
   0xf   : > { %s562_s8 = sshll.u32 %s741_s21, 9  ;;  %s546_s9 = sshll.u32 %s187_s7, 5 }
  0x10   : > { %s988_s30 = scalar_select %p832_p11, 1, 0 }
  0x11   : > { %s989_s6 = scalar_select %p836_p12, 1, 0 }
  0x12   : > { %s845_s12 = scalar_lea.hbm %s979_s0, %s562_s8  ;;  %s191_s13 = scalar_lea.vmem [#allocation2], %s546_s9 }
  0x13   : > { %s198_s14 = sshll.u32 %s191_s13, 4  ;;  %p849_p13 = pnand %p596_p10, %p821_p5  ;;  %s853_s14 = int_to_ptr.vmem [resolvable:$true] %s198_s14 }
  0x14   : > { %s855_s16 = scalar_lea.sflag [#allocation3], %s187_s7  ;;  %s645_s17 = scalar_lea.hbm %s845_s12, 512 }
  0x15   : > { %p646_p0 = scmp.ne.s32.totalorder %s845_s12, %s645_s17  ;;  %p647_p1 = pneg %p849_p13 }
  0x16   : > { %s650_s26 = scalar_lea.hbm %s979_s0, 1024  ;;  %p651_p4 = scmp.lt.u32.totalorder %s845_s12, %s979_s0 }
  0x17   : > { %p648_p2 = pnand %p647_p1, %p646_p0  ;;  %p652_p5 = scmp.lt.u32.totalorder %s650_s26, %s645_s17 }
  0x18   : > { %p654_p8 = scmp.lt.u32.totalorder %s645_s17, %s845_s12 }
  0x19   : > { %p649_p3 = pneg %p648_p2  ;;  %p653_p7 = por %p652_p5, %p651_p4 }
  0x1b   : > { %p655_p10 = por %p654_p8, %p653_p7 }
  0x1d   : > { %p656_p9 = pnand %p655_p10, %p649_p3 }
  0x1f   : > { %659 = shalt.err (!%p656_p9)
}
  0x20   : > { %s660_s7 = scalar_lea.vmem %s853_s14, 512  ;;  %s743_s9 = smov [#allocation2]  }
  0x21   : > { %p661_p0 = scmp.ne.s32.totalorder %s853_s14, %s660_s7  ;;  %s665_s10 = sshll.u32 %s743_s9, 4  ;;  %s666_s10 = int_to_ptr.vmem [resolvable:$false] %s665_s10 }
  0x22   : > { %s667_s11 = scalar_lea.vmem %s666_s10, 1024  ;;  %p668_p11 = scmp.lt.s32.totalorder %s853_s14, %s666_s10 }
  0x23   : > { %p663_p2 = pnand %p661_p0, %p647_p1  ;;  %p669_p4 = scmp.lt.s32.totalorder %s667_s11, %s660_s7 }
  0x25   : > { %p664_p12 = pneg %p663_p2  ;;  %p670_p5 = por %p669_p4, %p668_p11 }
  0x27   : > { %p671_p7 = pnand %p670_p5, %p664_p12 }
  0x29   : > { %674 = shalt.err (!%p671_p7)
}
  0x2a   : > { %s744_s13 = smov 256   ;;  %s745_s17 = smov 16  }
  0x2b   : > { %591 = dma.hbm_to_vmem [thread:$0]  (!%p849_p13), %s845_s12, 512, %s853_s14, %s855_s16, %s744_s13, %s744_s13, %s745_s17  }
  0x2c   : > { %p549_p9 = scmp.ge.s32.totalorder %s741_s21, 1  ;;  %p206_p1 = scmp.lt.s32.totalorder %s741_s21, 3 }
  0x2e   : > { %p207_p3 = pnand %p549_p9, %p206_p1 }
  0x2f   : > { %s886_s23 = sand.u32 (!%p207_p3), 1, %s733_s19  }
  0x30   : > { %210 = sbr.rel (%p207_p3) target bundleno = 828 (0x33c), region = 40  ;;  %s550_s25 = sshll.u32 (!%p207_p3), %s886_s23, 5 }
  0x31   : > { %s213_s26 = scalar_lea.sflag (!%p207_p3), [#allocation3], %s886_s23  ;;  %s216_s28 = scalar_lea.vmem (!%p207_p3), [#allocation2], %s550_s25 }
  0x37   : > { %720 = dma.done.wait (%p825_p6), %s213_s26, 512  }
  0x38   : > { %722 = vsyncadd (%p825_p6), %s213_s26, 4294966784  ;;  %v896_v0 = vld [vmem:[%s216_s28] sm:$0xff]  ;;  %v898_v1 = vld [vmem:[%s216_s28 + $0x8] sm:$0xff]  ;;  %v746_v6 = vmov 0.0|0.0   ;;  %vm747_vm0 = vmmov 0   ;;  %v748_v10 = vmov 0.0   ;;  %v258_v11 = vlaneseq }
  0x39   : > { %v900_v2 = vld [vmem:[%s216_s28 + $0x10] sm:$0xff]  ;;  %v247_v3 = vadd.f32 %v898_v1, %v896_v0  ;;  %v904_v4 = vld [vmem:[%s216_s28 + $0x18] sm:$0xff]  ;;  %581 = vmatprep.subr.bf16.mxu0 %v746_v6  ;;  %v253_v7 = vld [vmem:[%s980_s1] sm:$0xff]  ;;  %573 = vmatprep.mubr.msk.f32.mxu0 %vm747_vm0, %v748_v10  ;;  %vm269_vm1 = vcmask 130112   ;;  %vm271_vm2 = vcmask 130048   ;;  %vm357_vm3 = vcmask 1041408  }
  0x3a   : > { %v250_v5 = vadd.f32 %v904_v4, %v900_v2  ;;  %v254_v8 = vld [vmem:[%s980_s1 + $0x8] sm:$0xff]  ;;  %576 = vmatprep.subr.mxu1 %v748_v10  ;;  %578 = vmatprep.mubr.msk.f32.mxu1 %vm747_vm0, %v748_v10  ;;  %v259_v12 = vand.u32 127, %v258_v11  ;;  %v261_v13 = vshrl.u32 %v258_v11, 7  ;;  %v351_v22 = vld [vmem:[%s982_s3] sm:$0x3]  ;;  %vm353_vm4 = vcmask 15360  }
  0x3b   : > { %248 = vadd.xlane.f32.xlu0 %v247_v3  ;;  %v582_v9 = vpack.c.bf16 %v254_v8, %v253_v7  ;;  %577 = vmatpush3.msk.msra.mxu1 %vm357_vm3, %v351_v22  ;;  %v255_v23 = vld [vmem:[%s981_s2] sm:$0x1]  ;;  %s242_s13 = scalar_lea.vmem [#allocation5], %s550_s25  ;;  %s563_s26 = sshll.u32 %s803_s22, 9 }
  0x3c   : > { %v264_v14 = vadd.s32 4294967288, %v259_v12  ;;  %v262_v16 = vsub.s32 %v259_v12, %v261_v13  ;;  %v352_v32 = vld [vmem:[%s983_s4] sm:$0x1]  ;;  %v439_v39 = vsub.s32 0, %v261_v13  ;;  %s470_s17 = sshll.u32 %s242_s13, 4  ;;  %s933_s25 = scalar_lea.hbm %s984_s5, %s563_s26  ;;  %s928_s17 = int_to_ptr.vmem [resolvable:$true] %s470_s17 }
  0x3d   : > { %583 = vmatpush3.bf16.msra.mxu0 %v582_v9  ;;  %s457_s22 = scalar_lea.sflag [#allocation4], %s886_s23  ;;  %s675_s12 = scalar_lea.vmem %s928_s17, 512 }
  0x3e   : > { %v267_v17 = vsub.s32 %v264_v14, %v261_v13  ;;  %p676_p6 = scmp.ne.s32.totalorder %s928_s17, %s675_s12  ;;  %p991_p11 = scmp.ne.s32.totalorder %s988_s30, 0 }
  0x3f   : > { %251 = vadd.xlane.f32.xlu0 %v250_v5  ;;  %s749_s14 = smov [#allocation5]  }
  0x40   : > { %p677_p12 = pnand %p676_p6, %p991_p11  ;;  %s679_s15 = sshll.u32 %s749_s14, 4  ;;  %s680_s15 = int_to_ptr.vmem [resolvable:$false] %s679_s15 }
  0x41   : > { %s681_s16 = scalar_lea.vmem %s680_s15, 1024  ;;  %p682_p8 = scmp.lt.s32.totalorder %s928_s17, %s680_s15 }
  0x42   : > { %p678_p13 = pneg %p677_p12  ;;  %p683_p10 = scmp.lt.s32.totalorder %s681_s16, %s675_s12 }
  0x44   : > { %p684_p0 = por %p683_p10, %p682_p8 }
  0x46   : > { %p685_p2 = pnand %p684_p0, %p678_p13 }
  0xc8   : > { %v249_v15 = vpop.xlane.xlu0 %248 }
  0xc9   : > { %v263_v19 = vrot.slane %v249_v15, %v262_v16 }
  0xcc   : > { %v252_v18 = vpop.xlane.xlu0 %251 }
  0xcd   : > { %v268_v20 = vrot.slane %v252_v18, %v267_v17 }
  0xcf   : > { %v270_v21 = vsel %vm269_vm1, %v268_v20, %v263_v19 }
  0xd0   : > { %574 = vmatmul.mubr.msk.f32.vlgmr.msra.gmra.mrb[0].mxu0 %vm271_vm2, %v270_v21 }
 0x1a3   : > { %v340_v24 = vpop.f32.mrb[0].mxu0 }
 0x1a4   : > { %v341_v25 = vadd.f32 %v340_v24, %v255_v23  ;;  %v575_v26 = vpop.f32.mrb[1].mxu0 }
 0x1a6   : > { %v553_v27 = vmul.f32 -1.442695, %v341_v25 }
 0x1a8   : > { %637 = vpow2.f32 %v553_v27 }
 0x1b2   : > { %v638_v28 = vpop.eup %637 }
 0x1b3   : > { %v347_v29 = vadd.f32 1.0, %v638_v28 }
 0x1b5   : > { %639 = vrcp.f32 %v347_v29 }
 0x1bf   : > { %v640_v30 = vpop.eup %639 }
 0x1c0   : > { %v350_v31 = vmul.f32 %v640_v30, %v341_v25 }
 0x1c2   : > { %579 = vmatmul.mubr.msk.f32.vlgmr.msra.gmra.mrb[0].mxu1 %vm353_vm4, %v350_v31 }
 0x295   : > { %v427_v33 = vpop.f32.mrb[0].mxu1 }
 0x296   : > { %v428_v34 = vadd.f32 %v427_v33, %v352_v32  ;;  %v580_v35 = vpop.f32.mrb[1].mxu1 }
 0x298   : > { %v556_v36 = vmul.f32 -1.442695, %v428_v34 }
 0x29a   : > { %641 = vpow2.f32 %v556_v36 }
 0x2a4   : > { %v642_v37 = vpop.eup %641 }
 0x2a5   : > { %v434_v38 = vadd.f32 1.0, %v642_v37 }
 0x2a7   : > { %643 = vrcp.f32 %v434_v38 }
 0x2b1   : > { %v644_v40 = vpop.eup %643 }
 0x2b2   : > { %v440_v41 = vrot.slane %v644_v40, %v439_v39 }
 0x2b4   : > { %442 = vbcast.lane.b32.xlu1 %v440_v41, 256 }
 0x2b8   : > { %446 = vbcast.lane.b32.xlu1 %v440_v41, 264 }
 0x326   : > { %v443_v42 = vpop.permute.xlu1 %442 }
 0x327   : > { %v448_v43 = vmul.f32 %v443_v42, %v896_v0  ;;  %v449_v44 = vmul.f32 %v443_v42, %v898_v1 }
 0x329   : > { %452 = vst [vmem:[%s242_s13] sm:$0xff] %v448_v43  ;;  %453 = vst [vmem:[%s242_s13 + $0x8] sm:$0xff] %v449_v44 }
 0x32a   : > { %v447_v45 = vpop.permute.xlu1 %446 }
 0x32b   : > { %v450_v46 = vmul.f32 %v447_v45, %v900_v2  ;;  %v451_v47 = vmul.f32 %v447_v45, %v904_v4 }
 0x32d   : > { %454 = vst [vmem:[%s242_s13 + $0x10] sm:$0xff] %v450_v46  ;;  %455 = vst [vmem:[%s242_s13 + $0x18] sm:$0xff] %v451_v47 }
 0x32e   : > { %688 = shalt.err (!%p685_p2)
}
 0x32f   : > { %s689_s8 = scalar_lea.hbm %s933_s25, 512  ;;  %s693_s10 = scalar_lea.hbm %s984_s5, 1024 }
 0x330   : > { %p690_p4 = scmp.ne.s32.totalorder %s933_s25, %s689_s8  ;;  %p694_p9 = scmp.lt.u32.totalorder %s933_s25, %s984_s5 }
 0x331   : > { %p695_p1 = scmp.lt.u32.totalorder %s693_s10, %s689_s8  ;;  %p697_p6 = scmp.lt.u32.totalorder %s689_s8, %s933_s25 }
 0x332   : > { %p691_p5 = pnand %p690_p4, %p991_p11 }
 0x333   : > { %p696_p3 = por %p695_p1, %p694_p9 }
 0x334   : > { %p692_p7 = pneg %p691_p5 }
 0x335   : > { %p698_p12 = por %p697_p6, %p696_p3 }
 0x337   : > { %p699_p13 = pnand %p698_p12, %p692_p7 }
 0x339   : > { %702 = shalt.err (!%p699_p13)
}
 0x33a   : > { %s750_s26 = smov 256   ;;  %s751_s28 = smov 16  }
 0x33b   : > { %586 = dma.vmem_to_hbm [thread:$0]  (%p991_p11), %s928_s17, 512, %s933_s25, %s457_s22, %s750_s26, %s750_s26, %s751_s28  }
 0x33c PF: > { %s485_s29 = sand.u32 1, %s729_s18   ;;  %p992_p8 = scmp.ne.s32.totalorder %s989_s6, 0 }
 0x33d   : > { %p993_p10 = scmp.ge.s32.totalorder %s741_s21, 2  ;;  %s486_s12 = scalar_lea.sflag [#allocation4], %s485_s29 }
 0x33f   : > { %p593_p0 = pnand %p993_p10, %p992_p8 }
 0x341   : > { %724 = dma.done.wait (!%p593_p0), %s486_s12, 512  }
 0x342   : > { %726 = vsyncadd (!%p593_p0), %s486_s12, 4294966784  ;;  %p18_p2 = scmp.ge.s32.totalorder %s807_s24, 4   ;;  %s994_s18 = smov %s733_s19 }
 0x343   : > { %s995_s19 = smov %s737_s20  ;;  %s996_s20 = smov %s819_s27 }
 0x344   : > { %s997_s21 = smov %s807_s24  ;;  %20 = sbr.rel (!%p18_p2) target bundleno = 5 (0x5), region = 85 }
 0x34b   :  { %491 = vsyncpa [#allocation3], 1 }
 0x34c   :  { %493 = vsyncpa [#allocation3 + $0x1], 1 }
 0x34d   :  { %494 = vsyncpa [#allocation4], 1 }
 0x34e   :  { %496 = vsyncpa [#allocation4 + $0x1], 1 }

</bundles_post_ra>
